<compile_context>
chip_gen: v7x
topology: tpu7x:2x2x1
jax: 0.10.0
libtpu: 0.0.40
codegen_flags: <defaults>
</compile_context>

<pallas_src>
import functools

import jax
import jax.numpy as jnp
from jax.experimental import pallas as pl
from jax.experimental.pallas import tpu as pltpu


def _focal_loss_kernel(x_ref, t_ref, o_ref, *, gamma, alpha01, hw, tile_hw,
                       need_mask):
    x = x_ref[0].astype(jnp.float32)     # (C, T): classes on sublanes, space on lanes
    t = t_ref[0]                         # (1, T): int32 target class per column
    c, tcols = x.shape

    # Numerically-stable log-softmax over the class (sublane) axis.  The
    # gathered log p_t is x[target] - lse because lse is column-constant.
    m = jnp.max(x, axis=0, keepdims=True)                               # (1, T)
    lse = jnp.log(jnp.sum(jnp.exp(x - m), axis=0, keepdims=True)) + m   # (1, T)

    rows = jax.lax.broadcasted_iota(jnp.int32, (c, tcols), 0)
    onehot = rows == t                                                  # (C, T)
    x_tgt = jnp.sum(jnp.where(onehot, x, 0.0), axis=0, keepdims=True)   # (1, T)
    logpt = x_tgt - lse                                                 # (1, T)
    pt = jnp.exp(logpt)                  # matches the module: pt = logpt.exp()

    if alpha01 is not None:
        a0, a1 = alpha01
        # PyTorch module: select = (target != 0); at = alpha.gather(0, select)
        at = jnp.where(t != 0, jnp.float32(a1), jnp.float32(a0))
        logpt = logpt * at

    one_minus_pt = 1.0 - pt
    g = float(gamma)
    if g == 0.0:
        mod = jnp.ones_like(pt)
    elif g == int(g) and 0 < int(g) <= 8:
        mod = one_minus_pt
        for _ in range(int(g) - 1):
            mod = mod * one_minus_pt          # multiply chain on the VALU, no pow
    else:
        mod = one_minus_pt ** jnp.float32(g)

    loss = -mod * logpt                       # (1, T), all finite

    if need_mask:
        j = pl.program_id(1)
        col = j * tile_hw + jax.lax.broadcasted_iota(jnp.int32, (1, tcols), 1)
        loss = jnp.where(col < hw, loss, 0.0)

    partial = jnp.sum(loss)                   # one reduce per (large) tile
    # Partial sum in lane 0, exact zeros elsewhere -> wrapper reduction is a
    # plain jnp.sum with identical numerics (no strided slice needed).
    lane = jax.lax.broadcasted_iota(jnp.int32, (1, 1, 128), 2)
    o_ref[...] = jnp.where(lane == 0, partial, 0.0).astype(jnp.float32)


def _pick_tile_hw(hw, c, itemsize):
    """Largest lane-aligned spatial tile whose double-buffered logits block
    stays comfortably inside scoped VMEM on every TPU generation."""
    per_block_budget = 6 * 1024 * 1024                  # bytes per logits block
    max_cols = (per_block_budget // max(1, c * itemsize)) // 128 * 128
    max_cols = int(max(128, min(max_cols, 8192)))
    if hw <= max_cols:
        return hw          # full-extent block is always a legal block shape
    return max_cols        # multiple of 128; ragged tail is masked in-kernel


def focal_loss(logits_nchw, target_bhw, *, gamma=0.0, alpha=None,
               size_average=True, tile_hw=None):
    """Pallas implementation of FocalLoss.forward for NCHW logits.

    logits_nchw: [B, C, H, W] float (f32 or bf16; cast to f32 inside the kernel)
    target_bhw : [B, H, W] integer class indices
    alpha      : None, float/int (-> [alpha, 1-alpha]), or list [a0, a1, ...]
                 (gathered at index (target != 0), exactly like the module)
    """
    B, C, H, W = logits_nchw.shape
    HW = H * W
    x = logits_nchw.reshape(B, C, HW)                   # free reshape, no transpose
    t = target_bhw.reshape(B, 1, HW).astype(jnp.int32)

    if isinstance(alpha, (float, int)) and not isinstance(alpha, bool):
        alpha01 = (float(alpha), 1.0 - float(alpha))
    elif isinstance(alpha, (list, tuple)):
        alpha01 = (float(alpha[0]), float(alpha[1]))
    else:
        alpha01 = None

    itemsize = jnp.dtype(x.dtype).itemsize
    if tile_hw is None:
        tile_hw = _pick_tile_hw(HW, C, itemsize)
    ghw = pl.cdiv(HW, tile_hw)
    need_mask = (ghw * tile_hw != HW)

    kernel = functools.partial(
        _focal_loss_kernel, gamma=float(gamma), alpha01=alpha01,
        hw=HW, tile_hw=tile_hw, need_mask=need_mask)

    # Explicit scoped-VMEM budget (v5e's default is only 16 MiB); blocks are
    # sized so this stays far below v7x's 64 MiB physical VMEM.
    block_bytes = C * tile_hw * itemsize + tile_hw * 4 + 128 * 4
    vmem_limit = int(min(max(2 * block_bytes + (4 << 20), 16 << 20), 32 << 20))

    partials = pl.pallas_call(
        kernel,
        out_shape=jax.ShapeDtypeStruct((B, 1, ghw * 128), jnp.float32),
        grid_spec=pltpu.PrefetchScalarGridSpec(
            num_scalar_prefetch=0,
            grid=(B, ghw),
            in_specs=[
                pl.BlockSpec((1, C, tile_hw), lambda b, j: (b, 0, j)),
                pl.BlockSpec((1, 1, tile_hw), lambda b, j: (b, 0, j)),
            ],
            out_specs=pl.BlockSpec((1, 1, 128), lambda b, j: (b, 0, j)),
        ),
        compiler_params=pltpu.CompilerParams(
            dimension_semantics=("parallel", "parallel"),
            vmem_limit_bytes=vmem_limit),
    )(x, t)

    total = jnp.sum(partials)          # zeros everywhere except tile partials
    if size_average:
        return total / jnp.float32(B * HW)
    return total


def _focal_loss_ref(logits_nchw, target_bhw, *, gamma, alpha, size_average):
    B, C, H, W = logits_nchw.shape
    x = jnp.transpose(logits_nchw.reshape(B, C, H * W), (0, 2, 1)).reshape(-1, C)
    t = target_bhw.reshape(-1).astype(jnp.int32)
    logsm = jax.nn.log_softmax(x, axis=1)
    logpt = jnp.take_along_axis(logsm, t[:, None], axis=1)[:, 0]
    pt = jnp.exp(logpt)
    if alpha is not None:
        if isinstance(alpha, (float, int)):
            avec = jnp.array([alpha, 1.0 - alpha], jnp.float32)
        else:
            avec = jnp.array(alpha, jnp.float32)
        at = avec[(t != 0).astype(jnp.int32)]
        logpt = logpt * at
    loss = -1.0 * (1.0 - pt) ** gamma * logpt
    return loss.mean() if size_average else loss.sum()


if __name__ == "__main__":
    key = jax.random.PRNGKey(0)
    k1, k2 = jax.random.split(key)

    B, C, H, W = 2, 4, 16, 16
    logits = jax.random.normal(k1, (B, C, H, W), dtype=jnp.float32)
    target = jax.random.randint(k2, (B, H, W), 0, C, dtype=jnp.int32)

    gamma = 2.0
    alpha = 0.25          # -> alpha vector [0.25, 0.75], like the PyTorch init
    size_average = True

    out = focal_loss(logits, target, gamma=gamma, alpha=alpha,
                     size_average=size_average)
    out = jax.block_until_ready(out)

    ref = _focal_loss_ref(logits, target, gamma=gamma, alpha=alpha,
                          size_average=size_average)
    assert jnp.allclose(out, ref, rtol=1e-5, atol=1e-5), (out, ref)

    print("KERNEL_OK")
</pallas_src>

<mosaic_0001>
module attributes {stable_mosaic.version = 11 : i64} {
  func.func @_focal_loss_kernel(%arg0: i32, %arg1: i32, %arg2: memref<1x4x256xf32, #tpu.memory_space<vmem>>, %arg3: memref<1x1x256xi32, #tpu.memory_space<vmem>>, %arg4: memref<1x1x128xf32, #tpu.memory_space<vmem>>) attributes {dimension_semantics = [#tpu.dimension_semantics<parallel>, #tpu.dimension_semantics<parallel>], iteration_bounds = array<i64: 2, 1>, scalar_prefetch = 0 : i64, scratch_operands = 0 : i64, tpu.core_type = #tpu.core_type<tc>, window_params = [{transform_indices = @transform_0, window_bounds = array<i64: 1, 4, 256>}, {transform_indices = @transform_1, window_bounds = array<i64: 1, 1, 256>}, {transform_indices = @transform_2, window_bounds = array<i64: 1, 1, 128>}]} {
    %c0 = arith.constant 0 : index
    %c0_0 = arith.constant 0 : index
    %c0_1 = arith.constant 0 : index
    %0 = vector.load %arg2[%c0, %c0_0, %c0_1] : memref<1x4x256xf32, #tpu.memory_space<vmem>>, vector<1x4x256xf32>
    %1 = vector.shape_cast %0 : vector<1x4x256xf32> to vector<4x256xf32>
    %c0_2 = arith.constant 0 : index
    %c0_3 = arith.constant 0 : index
    %c0_4 = arith.constant 0 : index
    %2 = vector.load %arg3[%c0_2, %c0_3, %c0_4] : memref<1x1x256xi32, #tpu.memory_space<vmem>>, vector<1x1x256xi32>
    %3 = vector.shape_cast %2 : vector<1x1x256xi32> to vector<1x256xi32>
    %cst = arith.constant dense<0xFF800000> : vector<256xf32>
    %4 = vector.multi_reduction <maximumf>, %1, %cst [0] : vector<4x256xf32> to vector<256xf32>
    %5 = vector.shape_cast %4 : vector<256xf32> to vector<1x256xf32>
    %6 = vector.broadcast %5 : vector<1x256xf32> to vector<4x256xf32>
    %7 = arith.subf %1, %6 : vector<4x256xf32>
    %8 = math.exp %7 : vector<4x256xf32>
    %cst_5 = arith.constant dense<0.000000e+00> : vector<256xf32>
    %9 = vector.multi_reduction <add>, %8, %cst_5 [0] : vector<4x256xf32> to vector<256xf32>
    %10 = vector.shape_cast %9 : vector<256xf32> to vector<1x256xf32>
    %11 = math.log %10 : vector<1x256xf32>
    %12 = arith.addf %11, %5 : vector<1x256xf32>
    %13 = tpu.iota {dimensions = array<i32: 0>} : vector<4x256xi32>
    %14 = vector.broadcast %3 : vector<1x256xi32> to vector<4x256xi32>
    %15 = arith.cmpi eq, %13, %14 : vector<4x256xi32>
    %cst_6 = arith.constant 0.000000e+00 : f32
    %16 = vector.broadcast %cst_6 : f32 to vector<4x256xf32>
    %17 = arith.select %15, %1, %16 : vector<4x256xi1>, vector<4x256xf32>
    %cst_7 = arith.constant dense<0.000000e+00> : vector<256xf32>
    %18 = vector.multi_reduction <add>, %17, %cst_7 [0] : vector<4x256xf32> to vector<256xf32>
    %19 = vector.shape_cast %18 : vector<256xf32> to vector<1x256xf32>
    %20 = arith.subf %19, %12 : vector<1x256xf32>
    %21 = math.exp %20 : vector<1x256xf32>
    %c0_i32 = arith.constant 0 : i32
    %22 = vector.broadcast %c0_i32 : i32 to vector<1x256xi32>
    %23 = arith.cmpi ne, %3, %22 : vector<1x256xi32>
    %cst_8 = arith.constant 7.500000e-01 : f32
    %cst_9 = arith.constant 2.500000e-01 : f32
    %24 = vector.broadcast %cst_8 : f32 to vector<1x256xf32>
    %25 = vector.broadcast %cst_9 : f32 to vector<1x256xf32>
    %26 = arith.select %23, %24, %25 : vector<1x256xi1>, vector<1x256xf32>
    %27 = arith.mulf %20, %26 : vector<1x256xf32>
    %cst_10 = arith.constant 1.000000e+00 : f32
    %28 = vector.broadcast %cst_10 : f32 to vector<1x256xf32>
    %29 = arith.subf %28, %21 : vector<1x256xf32>
    %30 = arith.mulf %29, %29 : vector<1x256xf32>
    %cst_11 = arith.constant 0.000000e+00 : f32
    %31 = vector.broadcast %cst_11 : f32 to vector<1x256xf32>
    %32 = arith.subf %31, %30 : vector<1x256xf32>
    %33 = arith.mulf %32, %27 : vector<1x256xf32>
    %34 = vector.shape_cast %33 : vector<1x256xf32> to vector<1x1x256xf32>
    %cst_12 = arith.constant dense<0.000000e+00> : vector<1xf32>
    %35 = vector.multi_reduction <add>, %34, %cst_12 [1, 2] : vector<1x1x256xf32> to vector<1xf32>
    %36 = vector.shape_cast %35 : vector<1xf32> to vector<1x1x1xf32>
    %37 = vector.extract %36[0, 0, 0] : f32 from vector<1x1x1xf32>
    %38 = tpu.iota {dimensions = array<i32: 2>} : vector<1x1x128xi32>
    %c0_i32_13 = arith.constant 0 : i32
    %39 = vector.broadcast %c0_i32_13 : i32 to vector<1x1x128xi32>
    %40 = arith.cmpi eq, %38, %39 : vector<1x1x128xi32>
    %cst_14 = arith.constant 0.000000e+00 : f32
    %41 = vector.broadcast %37 : f32 to vector<1x1x128xf32>
    %42 = vector.broadcast %cst_14 : f32 to vector<1x1x128xf32>
    %43 = arith.select %40, %41, %42 : vector<1x1x128xi1>, vector<1x1x128xf32>
    %c0_15 = arith.constant 0 : index
    %c0_16 = arith.constant 0 : index
    %c0_17 = arith.constant 0 : index
    %44 = vector.load %arg4[%c0_15, %c0_16, %c0_17] : memref<1x1x128xf32, #tpu.memory_space<vmem>>, vector<1x1x128xf32>
    tpu.vector_store %arg4[%c0_15, %c0_16, %c0_17], %43 {strides = array<i32>} : memref<1x1x128xf32, #tpu.memory_space<vmem>>, vector<1x1x128xf32>,
    return
  }
  func.func @transform_0(%arg0: i32, %arg1: i32) -> (i32, i32, i32) {
    %c0_i32 = arith.constant 0 : i32
    %c0_i32_0 = arith.constant 0 : i32
    return %arg0, %c0_i32, %arg1 : i32, i32, i32
  }
  func.func @transform_1(%arg0: i32, %arg1: i32) -> (i32, i32, i32) {
    %c0_i32 = arith.constant 0 : i32
    %c0_i32_0 = arith.constant 0 : i32
    return %arg0, %c0_i32, %arg1 : i32, i32, i32
  }
  func.func @transform_2(%arg0: i32, %arg1: i32) -> (i32, i32, i32) {
    %c0_i32 = arith.constant 0 : i32
    %c0_i32_0 = arith.constant 0 : i32
    return %arg0, %c0_i32, %arg1 : i32, i32, i32
  }
}

</mosaic_0001>

<bundles_post_ra>
// kernel: tpu_custom_call.1
= control target key start
LH: loop header
LB: loop body
LE: loop exit
PB: predicated region body
PF: predicated region fallthrough
CT: control target
= control target key end

     0   :  { %7 = vsyncpa [#allocation3], 0  ;;  %s961_s0 = inlined_call_operand.hbm [shape: f32[2,4,256], index: 0, kind: input, shape index: {}]   ;;  %s962_s1 = inlined_call_operand.hbm [shape: s32[2,1,256], index: 1, kind: input, shape index: {}]   ;;  %s963_s2 = inlined_call_operand.hbm [shape: f32[2,1,128], index: 2, kind: output, shape index: {}]  }
   0x1   :  { %9 = vsyncpa [#allocation3 + $0x1], 0 }
   0x2   :  { %10 = vsyncpa [#allocation6], 0 }
   0x3   :  { %12 = vsyncpa [#allocation6 + $0x1], 0 }
   0x4   :  { %13 = vsyncpa [#allocation4], 0 }
   0x5   :  { %15 = vsyncpa [#allocation4 + $0x1], 0  ;;  %s731_s9 = smov 0   ;;  %s733_s10 = smov 0  }
   0x6   :  { %s735_s11 = smov 0   ;;  %s737_s12 = smov 0  }
   0x7   :  { %s739_s13 = smov 0   ;;  %s741_s14 = smov 0  }
   0x8 LB: > { %s465_s15 = sadd.s32 4294967295, %s710_s14   ;;  %s466_s16 = sadd.s32 4294967294, %s710_s14   ;;  %s710_s14 = sphi %s741_s14, %s21_s14   ;;  %s706_s13 = sphi %s739_s13, %s983_s13   ;;  %s702_s12 = sphi %s737_s12, %s982_s12   ;;  %s698_s11 = sphi %s735_s11, %s981_s11   ;;  %s694_s10 = sphi %s733_s10, %s980_s10   ;;  %s690_s9 = sphi %s731_s9, %s979_s9  }
   0x9   : > { %s33_s17 = sadd.s32 1, %s706_s13  ;;  %s42_s18 = sadd.s32 1, %s698_s11 }
   0xa   : > { %p35_p0 = scmp.ge.s32.totalorder %s33_s17, 2  ;;  %p49_p1 = scmp.ne.s32.totalorder %s698_s11, %s694_s10 }
   0xb   : > { %p50_p2 = scmp.eq.s32.totalorder %s710_s14, 0  ;;  %p55_p3 = scmp.ne.s32.totalorder %s694_s10, %s690_s9 }
   0xc   : > { %s985_s17 = smov (%p35_p0, %s33_s17), 0  ;;  %p56_p5 = scmp.eq.s32.totalorder %s465_s15, 0 }
   0xd   : > { %p772_p4 = por %p50_p2, %p49_p1  ;;  %s37_s20 = ssub.s32 %s706_s13, %s985_s17 }
   0xe   : > { %p109_p6 = scmp.eq.s32.totalorder %s465_s15, 1  ;;  %p40_p7 = scmp.eq.s32.totalorder %s37_s20, 0 }
   0xf   : > { %p778_p8 = por %p56_p5, %p55_p3  ;;  %p115_p10 = scmp.eq.s32.totalorder %s466_s16, 1 }
  0x10   : > { %p782_p9 = por %p109_p6, %p49_p1  ;;  %p502_p13 = scmp.lt.s32.totalorder %s710_s14, 2 }
  0x11   : > { %s967_s21 = scalar_select %p778_p8, 1, 0 }
  0x12   : > { %s968_s22 = scalar_select %p782_p9, 1, 0 }
  0x13   : > { %s787_s23 = scalar_select %p40_p7, %s698_s11, %s42_s18  }
  0x14   : > { %p789_p11 = por %p115_p10, %p55_p3  ;;  %s796_s25 = sand.u32 1, %s698_s11  }
  0x15   : > { %s469_s26 = sshll.u32 %s796_s25, 3  ;;  %s481_s27 = sshll.u32 %s706_s13, 7 }
  0x16   : > { %s969_s24 = scalar_select %p789_p11, 1, 0 }
  0x17   : > { %s803_s30 = scalar_lea.hbm %s961_s0, %s481_s27  ;;  %s139_s3 = scalar_lea.vmem [#allocation2], %s469_s26 }
  0x18   : > { %s149_s4 = sshll.u32 %s139_s3, 4  ;;  %p809_p0 = pnand %p502_p13, %p772_p4  ;;  %s805_s4 = int_to_ptr.vmem [resolvable:$true] %s149_s4 }
  0x19   : > { %s136_s6 = scalar_lea.sflag [#allocation3], %s796_s25  ;;  %s564_s7 = scalar_lea.hbm %s803_s30, 128 }
  0x1a   : > { %p565_p3 = scmp.ne.s32.totalorder %s803_s30, %s564_s7  ;;  %p566_p5 = pneg %p809_p0 }
  0x1b   : > { %s569_s16 = scalar_lea.hbm %s961_s0, 256  ;;  %p570_p4 = scmp.lt.u32.totalorder %s803_s30, %s961_s0 }
  0x1c   : > { %p567_p6 = pnand %p566_p5, %p565_p3  ;;  %p571_p10 = scmp.lt.u32.totalorder %s569_s16, %s564_s7 }
  0x1d   : > { %p573_p12 = scmp.lt.u32.totalorder %s564_s7, %s803_s30 }
  0x1e   : > { %p568_p7 = pneg %p567_p6  ;;  %p572_p13 = por %p571_p10, %p570_p4 }
  0x20   : > { %p574_p1 = por %p573_p12, %p572_p13 }
  0x22   : > { %p575_p2 = pnand %p574_p1, %p568_p7 }
  0x24   : > { %578 = shalt.err (!%p575_p2)
}
  0x25   : > { %s579_s20 = scalar_lea.vmem %s805_s4, 128  ;;  %s712_s26 = smov [#allocation2]  }
  0x26   : > { %p580_p3 = scmp.ne.s32.totalorder %s805_s4, %s579_s20  ;;  %s584_s27 = sshll.u32 %s712_s26, 4  ;;  %s585_s27 = int_to_ptr.vmem [resolvable:$false] %s584_s27 }
  0x27   : > { %s586_s28 = scalar_lea.vmem %s585_s27, 256  ;;  %p587_p9 = scmp.lt.s32.totalorder %s805_s4, %s585_s27 }
  0x28   : > { %p582_p6 = pnand %p580_p3, %p566_p5  ;;  %p588_p4 = scmp.lt.s32.totalorder %s586_s28, %s579_s20 }
  0x2a   : > { %p583_p11 = pneg %p582_p6  ;;  %p589_p10 = por %p588_p4, %p587_p9 }
  0x2c   : > { %p590_p12 = pnand %p589_p10, %p583_p11 }
  0x2e   : > { %593 = shalt.err (!%p590_p12)
}
  0x2f   : > { %494 = dma.hbm_to_vmem [thread:$0]  (!%p809_p0), %s803_s30, 128, %s805_s4, %s136_s6  }
  0x30   : > { %p971_p1 = scmp.lt.s32.totalorder %s710_s14, 3  ;;  %p972_p2 = scmp.ge.s32.totalorder %s710_s14, 1 }
  0x31   : > { %s472_s3 = sshll.u32 %s796_s25, 1  ;;  %s482_s7 = sshll.u32 %s706_s13, 5 }
  0x32   : > { %p845_p7 = pnand %p972_p2, %p971_p1  ;;  %s854_s16 = scalar_lea.hbm %s962_s1, %s482_s7 }
  0x33   : > { %s160_s18 = scalar_lea.vmem [#allocation5], %s472_s3  ;;  %s157_s30 = scalar_lea.sflag [#allocation6], %s796_s25 }
  0x34   : > { %s973_s29 = scalar_select %p845_p7, 1, 0 }
  0x35   : > { %s170_s19 = sshll.u32 %s160_s18, 4  ;;  %s594_s4 = scalar_lea.hbm %s854_s16, 32  ;;  %s171_s19 = int_to_ptr.vmem [resolvable:$true] %s170_s19 }
  0x36   : > { %p595_p9 = scmp.ne.s32.totalorder %s854_s16, %s594_s4  ;;  %s599_s26 = scalar_lea.hbm %s962_s1, 64 }
  0x37   : > { %p600_p3 = scmp.lt.u32.totalorder %s854_s16, %s962_s1  ;;  %p601_p6 = scmp.lt.u32.totalorder %s599_s26, %s594_s4 }
  0x38   : > { %p597_p11 = pnand %p595_p9, %p566_p5  ;;  %p603_p10 = scmp.lt.u32.totalorder %s594_s4, %s854_s16 }
  0x39   : > { %p602_p4 = por %p601_p6, %p600_p3 }
  0x3a   : > { %p598_p13 = pneg %p597_p11 }
  0x3b   : > { %p604_p12 = por %p603_p10, %p602_p4 }
  0x3d   : > { %p605_p1 = pnand %p604_p12, %p598_p13 }
  0x3f   : > { %608 = shalt.err (!%p605_p1)
}
  0x40   : > { %s609_s25 = scalar_lea.vmem %s171_s19, 32  ;;  %s713_s3 = smov [#allocation5]  }
  0x41   : > { %p610_p2 = scmp.ne.s32.totalorder %s171_s19, %s609_s25  ;;  %s614_s7 = sshll.u32 %s713_s3, 4  ;;  %s615_s7 = int_to_ptr.vmem [resolvable:$false] %s614_s7 }
  0x42   : > { %s616_s8 = scalar_lea.vmem %s615_s7, 64  ;;  %p617_p8 = scmp.lt.s32.totalorder %s171_s19, %s615_s7 }
  0x43   : > { %p612_p9 = pnand %p610_p2, %p566_p5  ;;  %p618_p7 = scmp.lt.s32.totalorder %s616_s8, %s609_s25 }
  0x45   : > { %p613_p11 = pneg %p612_p9  ;;  %p619_p3 = por %p618_p7, %p617_p8 }
  0x47   : > { %p620_p6 = pnand %p619_p3, %p613_p11 }
  0x49   : > { %623 = shalt.err (!%p620_p6)
}
  0x4a   : > { %497 = dma.hbm_to_vmem [thread:$0]  (!%p809_p0), %s854_s16, 32, %s171_s19, %s157_s30  }
  0x4b   : > { %p974_p13 = scmp.ne.s32.totalorder %s973_s29, 0 }
  0x4c   : > { %s879_s15 = sand.u32 (!%p974_p13), 1, %s694_s10   ;;  %p975_p5 = scmp.ne.s32.totalorder (!%p974_p13), %s967_s21, 0 }
  0x4d   : > { %179 = sbr.rel (%p974_p13) target bundleno = 397 (0x18d), region = 28  ;;  %s476_s18 = sshll.u32 (!%p974_p13), %s879_s15, 3 }
  0x4e   : > { %s182_s4 = scalar_lea.sflag (!%p974_p13), [#allocation3], %s879_s15  ;;  %s185_s6 = scalar_lea.vmem (!%p974_p13), [#allocation2], %s476_s18 }
  0x54   : > { %677 = dma.done.wait (%p975_p5), %s182_s4, 128  }
  0x55   : > { %679 = vsyncadd (%p975_p5), %s182_s4, 4294967168  ;;  %s477_s5 = sshll.u32 %s879_s15, 1  ;;  %s191_s29 = scalar_lea.sflag [#allocation6], %s879_s15 }
  0x56   : > { %s194_s16 = scalar_lea.vmem [#allocation5], %s477_s5 }
  0x57   : > { %681 = dma.done.wait (%p975_p5), %s191_s29, 32  }
  0x58   : > { %683 = vsyncadd (%p975_p5), %s191_s29, 4294967264  ;;  %vm226_vm0 = vcmask 1043456   ;;  %v221_v0 = vld [vmem:[%s185_s6] sm:$0xff]  ;;  %v271_v15 = vlaneseq  ;;  %v222_v22 = vld [vmem:[%s194_s16] sm:$0x3]  ;;  %vm328_vm4 = vcmask 1040384  }
  0x59   : > { %v224_v1 = vcombine.high %v221_v0, %v221_v0  ;;  %v227_v2 = vsel %vm226_vm0, %v221_v0, -inf  ;;  %vm305_vm3 = vcmp.ne.s32.totalorder %v222_v22, 0  ;;  %s478_s21 = sshll.u32 %s702_s12, 4  ;;  %s218_s19 = scalar_lea.vmem [#allocation7], %s879_s15 }
  0x5a   : > { %v228_v3 = vrot.slane %v227_v2, 4  ;;  %v896_v18 = vshrl.u32 %v271_v15, 7  ;;  %s361_s30 = sshll.u32 %s218_s19, 4  ;;  %s912_s28 = scalar_lea.hbm %s963_s2, %s478_s21  ;;  %s914_s30 = int_to_ptr.vmem [resolvable:$true] %s361_s30 }
  0x5b   : > { %v234_v4 = vsel %vm226_vm0, %v224_v1, -inf  ;;  %s348_s25 = scalar_lea.sflag [#allocation4], %s879_s15  ;;  %s624_s3 = scalar_lea.vmem %s914_s30, 16 }
  0x5c   : > { %v229_v5 = vmax.f32 %v227_v2, %v228_v3  ;;  %v235_v6 = vrot.slane %v234_v4, 4  ;;  %v275_v21 = vsub.s32 0, %v896_v18  ;;  %v279_v23 = vsub.s32 1, %v896_v18  ;;  %p625_p8 = scmp.ne.s32.totalorder %s914_s30, %s624_s3  ;;  %p976_p0 = scmp.ne.s32.totalorder %s968_s22, 0 }
  0x5d   : > { %s715_s12 = smov [#allocation7]  }
  0x5e   : > { %v230_v7 = vrot.slane %v229_v5, 2  ;;  %v236_v8 = vmax.f32 %v234_v4, %v235_v6  ;;  %v276_v24 = vrot.slane %v222_v22, %v275_v21  ;;  %v280_v25 = vrot.slane %v222_v22, %v279_v23  ;;  %p626_p7 = pnand %p625_p8, %p976_p0  ;;  %s628_s7 = sshll.u32 %s715_s12, 4  ;;  %s629_s7 = int_to_ptr.vmem [resolvable:$false] %s628_s7 }
  0x5f   : > { %v714_v4 = vmov 0.25   ;;  %s630_s8 = scalar_lea.vmem %s629_s7, 32  ;;  %p631_p10 = scmp.lt.s32.totalorder %s914_s30, %s629_s7 }
  0x60   : > { %v231_v9 = vmax.f32 %v229_v5, %v230_v7  ;;  %v237_v10 = vrot.slane %v236_v8, 2  ;;  %vm281_vm1 = vcmp.eq.s32.totalorder %v896_v18, %v276_v24  ;;  %vm282_vm2 = vcmp.eq.s32.totalorder %v896_v18, %v280_v25  ;;  %p627_p4 = pneg %p626_p7  ;;  %p632_p12 = scmp.lt.s32.totalorder %s630_s8, %s624_s3 }
  0x61   : > { %v283_v26 = vsel %vm281_vm1, %v221_v0, 0.0  ;;  %v284_v30 = vsel %vm282_vm2, %v224_v1, 0.0  ;;  %v306_v5 = vsel %vm305_vm3, 0.75, %v714_v4 }
  0x62   : > { %v232_v11 = vrot.slane %v231_v9, 1  ;;  %v238_v12 = vmax.f32 %v236_v8, %v237_v10  ;;  %v285_v32 = vsel %vm226_vm0, %v283_v26, 0.0  ;;  %v292_v36 = vsel %vm226_vm0, %v284_v30, 0.0  ;;  %p633_p1 = por %p632_p12, %p631_p10 }
  0x63   : > { %v286_v37 = vrot.slane %v285_v32, 4  ;;  %v293_v40 = vrot.slane %v292_v36, 4  ;;  %v311_v6 = vrot.slane %v306_v5, %v275_v21  ;;  %v315_v8 = vrot.slane %v306_v5, %v279_v23 }
  0x64   : > { %v233_v13 = vmax.f32 %v231_v9, %v232_v11  ;;  %v239_v14 = vrot.slane %v238_v12, 1  ;;  %p634_p2 = pnand %p633_p1, %p627_p4 }
  0x65   : > { %v287_v43 = vadd.f32 %v286_v37, %v285_v32  ;;  %v294_v46 = vadd.f32 %v293_v40, %v292_v36 }
  0x66   : > { %v240_v16 = vmax.f32 %v238_v12, %v239_v14 }
  0x67   : > { %v288_v49 = vrot.slane %v287_v43, 2  ;;  %v295_v51 = vrot.slane %v294_v46, 2 }
  0x68   : > { %v243_v17 = vcombine.low %v233_v13, %v240_v16 }
  0x69   : > { %v289_v52 = vadd.f32 %v288_v49, %v287_v43  ;;  %v296_v53 = vadd.f32 %v295_v51, %v294_v46 }
  0x6a   : > { %v245_v19 = vsub.f32 %v221_v0, %v243_v17 }
  0x6b   : > { %v290_v54 = vrot.slane %v289_v52, 1  ;;  %v297_v55 = vrot.slane %v296_v53, 1 }
  0x6c   : > { %v246_v20 = vmul.f32 1.442695, %v245_v19 }
  0x6d   : > { %v291_v58 = vadd.f32 %v290_v54, %v289_v52  ;;  %v298_v62 = vadd.f32 %v297_v55, %v296_v53 }
  0x6e   : > { %554 = vpow2.f32 %v246_v20 }
  0x78   : > { %v555_v27 = vpop.eup %554 }
  0x79   : > { %v249_v28 = vcombine.high %v555_v27, %v555_v27  ;;  %v251_v29 = vsel %vm226_vm0, %v555_v27, 0.0 }
  0x7a   : > { %v252_v31 = vrot.slane %v251_v29, 4 }
  0x7b   : > { %v258_v33 = vsel %vm226_vm0, %v249_v28, 0.0 }
  0x7c   : > { %v253_v34 = vadd.f32 %v252_v31, %v251_v29  ;;  %v259_v35 = vrot.slane %v258_v33, 4  ;;  %v342_v31 = vand.u32 127, %v271_v15 }
  0x7e   : > { %v254_v38 = vrot.slane %v253_v34, 2  ;;  %v260_v39 = vadd.f32 %v259_v35, %v258_v33  ;;  %vm343_vm5 = vcmp.eq.s32.totalorder %v342_v31, 0 }
  0x80   : > { %v255_v41 = vadd.f32 %v254_v38, %v253_v34  ;;  %v261_v42 = vrot.slane %v260_v39, 2 }
  0x82   : > { %v256_v44 = vrot.slane %v255_v41, 1  ;;  %v262_v45 = vadd.f32 %v261_v42, %v260_v39 }
  0x84   : > { %v257_v47 = vadd.f32 %v256_v44, %v255_v41  ;;  %v263_v48 = vrot.slane %v262_v45, 1 }
  0x86   : > { %v264_v50 = vadd.f32 %v263_v48, %v262_v45  ;;  %556 = vlog2.f32 %v257_v47 }
  0x88   : > { %558 = vlog2.f32 %v264_v50 }
  0x90   : > { %v557_v56 = vpop.eup %556 }
  0x91   : > { %v266_v57 = vmul.f32 0.6931472, %v557_v56 }
  0x92   : > { %v559_v59 = vpop.eup %558 }
  0x93   : > { %v268_v60 = vmul.f32 0.6931472, %v559_v59  ;;  %v269_v61 = vadd.f32 %v266_v57, %v233_v13 }
  0x95   : > { %v270_v63 = vadd.f32 %v268_v60, %v240_v16  ;;  %v299_v0 = vsub.f32 %v291_v58, %v269_v61 }
  0x97   : > { %v300_v1 = vsub.f32 %v298_v62, %v270_v63  ;;  %v301_v2 = vmul.f32 1.442695, %v299_v0  ;;  %v318_v11 = vmul.f32 %v311_v6, %v299_v0 }
  0x99   : > { %560 = vpow2.f32 %v301_v2  ;;  %v303_v3 = vmul.f32 1.442695, %v300_v1  ;;  %v319_v13 = vmul.f32 %v315_v8, %v300_v1 }
  0x9b   : > { %562 = vpow2.f32 %v303_v3 }
  0xa3   : > { %v561_v7 = vpop.eup %560 }
  0xa4   : > { %v320_v9 = vsub.f32 1.0, %v561_v7 }
  0xa5   : > { %v563_v10 = vpop.eup %562 }
  0xa6   : > { %v321_v12 = vsub.f32 1.0, %v563_v10  ;;  %v322_v14 = vmul.f32 %v320_v9, %v320_v9 }
  0xa8   : > { %v323_v17 = vmul.f32 %v321_v12, %v321_v12  ;;  %v324_v16 = vsub.f32 0.0, %v322_v14 }
  0xaa   : > { %v325_v18 = vsub.f32 0.0, %v323_v17  ;;  %v326_v19 = vmul.f32 %v324_v16, %v318_v11 }
  0xac   : > { %v327_v20 = vmul.f32 %v325_v18, %v319_v13  ;;  %v329_v22 = vsel %vm328_vm4, %v326_v19, 0.0 }
  0xae   : > { %v330_v24 = vsel %vm328_vm4, %v327_v20, 0.0 }
  0xaf   : > { %v331_v25 = vadd.f32 %v330_v24, %v329_v22 }
  0xb1   : > { %332 = vadd.xlane.f32.xlu0 %v331_v25 }
 0x13e   : > { %v333_v21 = vpop.xlane.xlu0 %332 }
 0x13f   : > { %v334_v23 = vrot.slane %v333_v21, 4 }
 0x141   : > { %v335_v26 = vadd.f32 %v334_v23, %v333_v21 }
 0x143   : > { %v336_v27 = vrot.slane %v335_v26, 2 }
 0x145   : > { %v337_v28 = vadd.f32 %v336_v27, %v335_v26 }
 0x147   : > { %v338_v29 = vrot.slane %v337_v28, 1 }
 0x149   : > { %v339_v30 = vadd.f32 %v338_v29, %v337_v28 }
 0x14b   : > { %483 = vpush %v339_v30 }
 0x17c   : > { %s484_s20 = spop %483 }
 0x17d   : > { %v344_v32 = vstv %s484_s20 }
 0x17e   : > { %v345_v33 = vsel %vm343_vm5, %v344_v32, 0.0 }
 0x17f   : > { %346 = vst [vmem:[%s218_s19] sm:$0x1] %v345_v33 }
 0x180   : > { %637 = shalt.err (!%p634_p2)
}
 0x181   : > { %s638_s15 = scalar_lea.hbm %s912_s28, 16  ;;  %s642_s6 = scalar_lea.hbm %s963_s2, 32 }
 0x182   : > { %p639_p9 = scmp.ne.s32.totalorder %s912_s28, %s638_s15  ;;  %p643_p6 = scmp.lt.u32.totalorder %s912_s28, %s963_s2 }
 0x183   : > { %p644_p13 = scmp.lt.u32.totalorder %s642_s6, %s638_s15  ;;  %p646_p8 = scmp.lt.u32.totalorder %s638_s15, %s912_s28 }
 0x184   : > { %p640_p11 = pnand %p639_p9, %p976_p0 }
 0x185   : > { %p645_p5 = por %p644_p13, %p643_p6 }
 0x186   : > { %p641_p3 = pneg %p640_p11 }
 0x187   : > { %p647_p7 = por %p646_p8, %p645_p5 }
 0x189   : > { %p648_p4 = pnand %p647_p7, %p641_p3 }
 0x18b   : > { %651 = shalt.err (!%p648_p4)
}
 0x18c   : > { %489 = dma.vmem_to_hbm [thread:$0]  (%p976_p0), %s914_s30, 16, %s912_s28, %s348_s25  }
 0x18d PF: > { %s373_s16 = sand.u32 1, %s690_s9   ;;  %p977_p10 = scmp.ne.s32.totalorder %s969_s24, 0 }
 0x18e   : > { %p978_p12 = scmp.ge.s32.totalorder %s710_s14, 2  ;;  %s374_s21 = scalar_lea.sflag [#allocation4], %s373_s16 }
 0x190   : > { %p499_p1 = pnand %p978_p12, %p977_p10 }
 0x192   : > { %685 = dma.done.wait (!%p499_p1), %s374_s21, 16  }
 0x193   : > { %687 = vsyncadd (!%p499_p1), %s374_s21, 4294967280  ;;  %s21_s14 = sadd.s32 1, %s710_s14   ;;  %s979_s9 = smov %s694_s10 }
 0x194   : > { %p18_p2 = scmp.ge.s32.totalorder %s21_s14, 4   ;;  %s980_s10 = smov %s698_s11 }
 0x195   : > { %s981_s11 = smov %s787_s23  ;;  %s982_s12 = smov %s706_s13 }
 0x196   : > { %s983_s13 = smov %s985_s17  ;;  %20 = sbr.rel (!%p18_p2) target bundleno = 8 (0x8), region = 86 }
 0x19d   :  { %378 = vsyncpa [#allocation3], 1 }
 0x19e   :  { %380 = vsyncpa [#allocation3 + $0x1], 1 }
 0x19f   :  { %381 = vsyncpa [#allocation6], 1 }
 0x1a0   :  { %383 = vsyncpa [#allocation6 + $0x1], 1 }
 0x1a1   :  { %384 = vsyncpa [#allocation4], 1 }
 0x1a2   :  { %386 = vsyncpa [#allocation4 + $0x1], 1 }

</bundles_post_ra>
